<compile_context>
chip_gen: v7x
topology: tpu7x:2x2x1
jax: 0.10.0
libtpu: 0.0.40
codegen_flags: <defaults>
</compile_context>

<pallas_src>
import functools

import jax
import jax.numpy as jnp
from jax.experimental import pallas as pl
from jax.experimental.pallas import tpu as pltpu


_NEG_LARGE = -1e30  # finite "-inf" so padded lanes never create NaNs


def _round_up(x, m):
    return ((x + m - 1) // m) * m


def _default_exp_dtype():
    """bf16 exp on chips with a bf16 EUP path (v6e/v7x); f32 otherwise."""
    try:
        kind = jax.devices()[0].device_kind.lower()
    except Exception:
        return jnp.float32
    for old in ("v2", "v3", "v4", "v5"):
        if old in kind:
            return jnp.float32
    return jnp.bfloat16


# ----------------------------- Fused kernel --------------------------------

def _make_fused_mlp_kernel(num_hidden, compute_dtype, exp_dtype):
    """Build a kernel computing the full MLP for one batch tile.

    Ref order: x, (w, b) * num_hidden, w_out, b_out, out.
    Weights are (D_in, D_out) bf16; biases are (1, D_out) f32. The output
    bias carries -1e30 in its padded lanes (class mask baked in).
    """

    def kernel(x_ref, *refs):
        o_ref = refs[-1]
        h = x_ref[...]                                   # (tb, D_in) f32

        # Hidden layers: Linear -> ReLU -> Dropout (eval mode: identity).
        for li in range(num_hidden):
            w = refs[2 * li][...]                        # (K, N) bf16
            b = refs[2 * li + 1][...]                    # (1, N) f32
            y = jnp.dot(h.astype(compute_dtype), w.astype(compute_dtype),
                        preferred_element_type=jnp.float32)
            h = jnp.maximum(y + b, 0.0)                  # bias/ReLU in f32 (VPU)

        # Output layer; padded lanes get 0*h + (-1e30) from the bias, so no
        # explicit mask is needed. Numerically stable log_softmax.
        w_out = refs[2 * num_hidden][...]                # (K, out_pad) bf16
        b_out = refs[2 * num_hidden + 1][...]            # (1, out_pad) f32
        z = jnp.dot(h.astype(compute_dtype), w_out.astype(compute_dtype),
                    preferred_element_type=jnp.float32) + b_out
        m = jnp.max(z, axis=1, keepdims=True)
        s = z - m                                        # f32
        p = jnp.exp(s.astype(exp_dtype))                 # EUP (bf16 on v6e/v7x)
        lse = jnp.log(jnp.sum(p.astype(jnp.float32), axis=1, keepdims=True))
        o_ref[...] = (s - lse).astype(o_ref.dtype)       # lane-dense bf16 store

    return kernel


# ----------------------------- Model wrapper -------------------------------

def init_classifier_params(key, input_size, output_size, hidden_layers,
                           lane_pad=128, weight_dtype=jnp.bfloat16):
    """nn.Linear-style U(-1/sqrt(fan_in), 1/sqrt(fan_in)) init.

    Weights stored (in, out) (transposed from PyTorch) in bf16 for the MXU;
    biases stored (1, out) in f32. Hidden widths are zero-padded to a multiple
    of `lane_pad` (padded lanes stay exactly 0 through ReLU). The output layer
    is padded to a multiple of `lane_pad`: weight columns zero, bias lanes
    -1e30, so the class mask is baked into the bias.
    """
    params = {"hidden": [], "output": None}
    in_logical = input_size
    in_padded = input_size               # never pad the true input dimension
    for h in hidden_layers:
        key, kw, kb = jax.random.split(key, 3)
        bound = 1.0 / (in_logical ** 0.5)
        w = jax.random.uniform(kw, (in_logical, h), jnp.float32, -bound, bound)
        b = jax.random.uniform(kb, (1, h), jnp.float32, -bound, bound)
        h_pad = _round_up(h, lane_pad)
        w = jnp.pad(w, ((0, in_padded - in_logical), (0, h_pad - h)))
        b = jnp.pad(b, ((0, 0), (0, h_pad - h)))
        params["hidden"].append((w.astype(weight_dtype), b))
        in_logical, in_padded = h, h_pad

    key, kw, kb = jax.random.split(key, 3)
    bound = 1.0 / (in_logical ** 0.5)
    w = jax.random.uniform(kw, (in_logical, output_size), jnp.float32,
                           -bound, bound)
    b = jax.random.uniform(kb, (1, output_size), jnp.float32, -bound, bound)
    out_pad = _round_up(output_size, lane_pad)
    w = jnp.pad(w, ((0, in_padded - in_logical), (0, out_pad - output_size)))
    b = jnp.pad(b, ((0, 0), (0, out_pad - output_size)),
                constant_values=_NEG_LARGE)     # class mask baked into bias
    params["output"] = (w.astype(weight_dtype), b)
    return params


def classifier_forward(params, x, *, output_size, batch_tile=2048,
                       compute_dtype=jnp.bfloat16, exp_dtype=None):
    """Single fused pallas_call over the whole MLP (eval-mode dropout)."""
    if exp_dtype is None:
        exp_dtype = _default_exp_dtype()

    hidden = params["hidden"]
    w_out, b_out = params["output"]
    out_pad = w_out.shape[1]

    B, D = x.shape
    # Batch tile: multiple of 8, at least 2 grid steps for moderate batches so
    # v7x's two TensorCores both get work, capped at batch_tile to amortize
    # the ~0.35 us per-grid-step overhead at large B.
    tb = min(batch_tile, max(8, _round_up(pl.cdiv(B, 2), 8)))
    b_pad = _round_up(B, tb)
    if b_pad != B:
        x = jnp.pad(x, ((0, b_pad - B), (0, 0)))

    layers = list(hidden) + [(w_out, b_out)]
    flat_wb = []
    for w, b in layers:
        flat_wb += [w, b]

    # Scaling guard: weight/bias blocks are VMEM-resident (constant index_map)
    # but still allocated double-buffered by default. For large models, drop
    # them to a single buffer and raise the scoped VMEM limit.
    wb_bytes = sum(int(a.size) * a.dtype.itemsize for a in flat_wb)
    act_bytes = 2 * tb * (D * x.dtype.itemsize + out_pad * 2)  # dbl-buffered I/O
    big_weights = (2 * wb_bytes + act_bytes) > (12 << 20)
    wb_kwargs = {"pipeline_mode": pl.Buffered(1)} if big_weights else {}

    in_specs = [pl.BlockSpec((tb, D), lambda i: (i, 0))]
    for w, b in layers:
        in_specs += [pl.BlockSpec(w.shape, lambda i: (0, 0), **wb_kwargs),
                     pl.BlockSpec(b.shape, lambda i: (0, 0), **wb_kwargs)]

    cp_kwargs = dict(dimension_semantics=("parallel",))
    if big_weights:
        cp_kwargs["vmem_limit_bytes"] = min(
            2 * (wb_bytes + act_bytes) + (4 << 20), 64 << 20)

    kernel = _make_fused_mlp_kernel(len(hidden), compute_dtype, exp_dtype)

    out = pl.pallas_call(
        kernel,
        out_shape=jax.ShapeDtypeStruct((b_pad, out_pad), jnp.bfloat16),
        grid=(b_pad // tb,),
        in_specs=in_specs,
        out_specs=pl.BlockSpec((tb, out_pad), lambda i: (i, 0)),
        compiler_params=pltpu.CompilerParams(**cp_kwargs),
    )(x, *flat_wb)

    # Callers get f32 log-probs of the logical class count.
    return out[:B, :output_size].astype(jnp.float32)


# --------------------------------- Main ------------------------------------

if __name__ == "__main__":
    batch = 8
    input_size = 32
    hidden_layers = [64, 32]
    output_size = 10

    key = jax.random.PRNGKey(0)
    key, kx = jax.random.split(key)
    x = jax.random.normal(kx, (batch, input_size), dtype=jnp.float32)

    params = init_classifier_params(key, input_size, output_size, hidden_layers)

    fwd = jax.jit(functools.partial(classifier_forward, output_size=output_size))
    out = jax.block_until_ready(fwd(params, x))

    assert out.shape == (batch, output_size)

    # log_softmax rows must exp-sum to ~1 (bf16 output store => ~1% tolerance)
    row_sums = jnp.exp(out).sum(axis=1)
    assert bool(jnp.all(jnp.abs(row_sums - 1.0) < 2e-2))

    # pure-JAX reference (same padded weights, f32 math); loose tol since the
    # kernel uses bf16 MXU operands, bf16 exp, and a bf16 output store.
    def ref_forward(p, xin):
        h = xin
        for w, b in p["hidden"]:
            h = jnp.maximum(jnp.dot(h, w.astype(jnp.float32)) + b, 0.0)
        w, b = p["output"]
        z = (jnp.dot(h, w.astype(jnp.float32)) + b)[:, :output_size]
        return jax.nn.log_softmax(z, axis=1)

    ref = ref_forward(params, x)
    assert bool(jnp.all(jnp.abs(out - ref) < 0.1))

    print("KERNEL_OK")
</pallas_src>

<mosaic_0001>
module attributes {stable_mosaic.version = 11 : i64} {
  func.func @kernel(%arg0: i32, %arg1: memref<8x32xf32, #tpu.memory_space<vmem>>, %arg2: memref<32x128xbf16, #tpu.memory_space<vmem>>, %arg3: memref<1x128xf32, #tpu.memory_space<vmem>>, %arg4: memref<128x128xbf16, #tpu.memory_space<vmem>>, %arg5: memref<1x128xf32, #tpu.memory_space<vmem>>, %arg6: memref<128x128xbf16, #tpu.memory_space<vmem>>, %arg7: memref<1x128xf32, #tpu.memory_space<vmem>>, %arg8: memref<8x128xbf16, #tpu.memory_space<vmem>>) attributes {dimension_semantics = [#tpu.dimension_semantics<parallel>], iteration_bounds = array<i64: 1>, scalar_prefetch = 0 : i64, scratch_operands = 0 : i64, tpu.core_type = #tpu.core_type<tc>, window_params = [{transform_indices = @transform_0, window_bounds = array<i64: 8, 32>}, {pipeline_mode = #tpu.pipeline_mode<synchronous>, transform_indices = @transform_1, window_bounds = array<i64: 32, 128>}, {pipeline_mode = #tpu.pipeline_mode<synchronous>, transform_indices = @transform_2, window_bounds = array<i64: 1, 128>}, {pipeline_mode = #tpu.pipeline_mode<synchronous>, transform_indices = @transform_3, window_bounds = array<i64: 128, 128>}, {pipeline_mode = #tpu.pipeline_mode<synchronous>, transform_indices = @transform_4, window_bounds = array<i64: 1, 128>}, {pipeline_mode = #tpu.pipeline_mode<synchronous>, transform_indices = @transform_5, window_bounds = array<i64: 128, 128>}, {pipeline_mode = #tpu.pipeline_mode<synchronous>, transform_indices = @transform_6, window_bounds = array<i64: 1, 128>}, {transform_indices = @transform_7, window_bounds = array<i64: 8, 128>}]} {
    %c0 = arith.constant 0 : index
    %c0_0 = arith.constant 0 : index
    %0 = vector.load %arg1[%c0, %c0_0] : memref<8x32xf32, #tpu.memory_space<vmem>>, vector<8x32xf32>
    %c0_1 = arith.constant 0 : index
    %c0_2 = arith.constant 0 : index
    %1 = vector.load %arg2[%c0_1, %c0_2] : memref<32x128xbf16, #tpu.memory_space<vmem>>, vector<32x128xbf16>
    %c0_3 = arith.constant 0 : index
    %c0_4 = arith.constant 0 : index
    %2 = vector.load %arg3[%c0_3, %c0_4] : memref<1x128xf32, #tpu.memory_space<vmem>>, vector<1x128xf32>
    %3 = arith.truncf %0 : vector<8x32xf32> to vector<8x32xbf16>
    %cst = arith.constant dense<0.000000e+00> : vector<8x128xf32>
    %4 = tpu.matmul %3, %1, %cst {dimension_numbers = #tpu.dot_dimension_numbers<[1], [0], [0], [1], [0, 0, 1, 1], [], []>} : vector<8x32xbf16>, vector<32x128xbf16>, vector<8x128xf32> -> vector<8x128xf32>
    %5 = vector.broadcast %2 : vector<1x128xf32> to vector<8x128xf32>
    %6 = arith.addf %4, %5 : vector<8x128xf32>
    %cst_5 = arith.constant 0.000000e+00 : f32
    %7 = vector.broadcast %cst_5 : f32 to vector<8x128xf32>
    %8 = arith.maximumf %6, %7 : vector<8x128xf32>
    %c0_6 = arith.constant 0 : index
    %c0_7 = arith.constant 0 : index
    %9 = vector.load %arg4[%c0_6, %c0_7] : memref<128x128xbf16, #tpu.memory_space<vmem>>, vector<128x128xbf16>
    %c0_8 = arith.constant 0 : index
    %c0_9 = arith.constant 0 : index
    %10 = vector.load %arg5[%c0_8, %c0_9] : memref<1x128xf32, #tpu.memory_space<vmem>>, vector<1x128xf32>
    %11 = arith.truncf %8 : vector<8x128xf32> to vector<8x128xbf16>
    %cst_10 = arith.constant dense<0.000000e+00> : vector<8x128xf32>
    %12 = tpu.matmul %11, %9, %cst_10 {dimension_numbers = #tpu.dot_dimension_numbers<[1], [0], [0], [1], [0, 0, 1, 1], [], []>} : vector<8x128xbf16>, vector<128x128xbf16>, vector<8x128xf32> -> vector<8x128xf32>
    %13 = vector.broadcast %10 : vector<1x128xf32> to vector<8x128xf32>
    %14 = arith.addf %12, %13 : vector<8x128xf32>
    %cst_11 = arith.constant 0.000000e+00 : f32
    %15 = vector.broadcast %cst_11 : f32 to vector<8x128xf32>
    %16 = arith.maximumf %14, %15 : vector<8x128xf32>
    %c0_12 = arith.constant 0 : index
    %c0_13 = arith.constant 0 : index
    %17 = vector.load %arg6[%c0_12, %c0_13] : memref<128x128xbf16, #tpu.memory_space<vmem>>, vector<128x128xbf16>
    %c0_14 = arith.constant 0 : index
    %c0_15 = arith.constant 0 : index
    %18 = vector.load %arg7[%c0_14, %c0_15] : memref<1x128xf32, #tpu.memory_space<vmem>>, vector<1x128xf32>
    %19 = arith.truncf %16 : vector<8x128xf32> to vector<8x128xbf16>
    %cst_16 = arith.constant dense<0.000000e+00> : vector<8x128xf32>
    %20 = tpu.matmul %19, %17, %cst_16 {dimension_numbers = #tpu.dot_dimension_numbers<[1], [0], [0], [1], [0, 0, 1, 1], [], []>} : vector<8x128xbf16>, vector<128x128xbf16>, vector<8x128xf32> -> vector<8x128xf32>
    %21 = vector.broadcast %18 : vector<1x128xf32> to vector<8x128xf32>
    %22 = arith.addf %20, %21 : vector<8x128xf32>
    %cst_17 = arith.constant dense<0xFF800000> : vector<8xf32>
    %23 = vector.multi_reduction <maximumf>, %22, %cst_17 [1] : vector<8x128xf32> to vector<8xf32>
    %24 = vector.shape_cast %23 : vector<8xf32> to vector<8x1xf32>
    %25 = vector.broadcast %24 : vector<8x1xf32> to vector<8x128xf32>
    %26 = arith.subf %22, %25 : vector<8x128xf32>
    %27 = arith.truncf %26 : vector<8x128xf32> to vector<8x128xbf16>
    %28 = math.exp %27 : vector<8x128xbf16>
    %29 = arith.extf %28 : vector<8x128xbf16> to vector<8x128xf32>
    %cst_18 = arith.constant dense<0.000000e+00> : vector<8xf32>
    %30 = vector.multi_reduction <add>, %29, %cst_18 [1] : vector<8x128xf32> to vector<8xf32>
    %31 = vector.shape_cast %30 : vector<8xf32> to vector<8x1xf32>
    %32 = math.log %31 : vector<8x1xf32>
    %33 = vector.broadcast %32 : vector<8x1xf32> to vector<8x128xf32>
    %34 = arith.subf %26, %33 : vector<8x128xf32>
    %35 = arith.truncf %34 : vector<8x128xf32> to vector<8x128xbf16>
    %c0_19 = arith.constant 0 : index
    %c0_20 = arith.constant 0 : index
    %36 = vector.load %arg8[%c0_19, %c0_20] : memref<8x128xbf16, #tpu.memory_space<vmem>>, vector<8x128xbf16>
    tpu.vector_store %arg8[%c0_19, %c0_20], %35 {strides = array<i32>} : memref<8x128xbf16, #tpu.memory_space<vmem>>, vector<8x128xbf16>,
    return
  }
  func.func @transform_0(%arg0: i32) -> (i32, i32) {
    %c0_i32 = arith.constant 0 : i32
    %c0_i32_0 = arith.constant 0 : i32
    return %arg0, %c0_i32 : i32, i32
  }
  func.func @transform_1(%arg0: i32) -> (i32, i32) {
    %c0_i32 = arith.constant 0 : i32
    %c0_i32_0 = arith.constant 0 : i32
    %c0_i32_1 = arith.constant 0 : i32
    return %c0_i32, %c0_i32_0 : i32, i32
  }
  func.func @transform_2(%arg0: i32) -> (i32, i32) {
    %c0_i32 = arith.constant 0 : i32
    %c0_i32_0 = arith.constant 0 : i32
    %c0_i32_1 = arith.constant 0 : i32
    return %c0_i32, %c0_i32_0 : i32, i32
  }
  func.func @transform_3(%arg0: i32) -> (i32, i32) {
    %c0_i32 = arith.constant 0 : i32
    %c0_i32_0 = arith.constant 0 : i32
    %c0_i32_1 = arith.constant 0 : i32
    return %c0_i32, %c0_i32_0 : i32, i32
  }
  func.func @transform_4(%arg0: i32) -> (i32, i32) {
    %c0_i32 = arith.constant 0 : i32
    %c0_i32_0 = arith.constant 0 : i32
    %c0_i32_1 = arith.constant 0 : i32
    return %c0_i32, %c0_i32_0 : i32, i32
  }
  func.func @transform_5(%arg0: i32) -> (i32, i32) {
    %c0_i32 = arith.constant 0 : i32
    %c0_i32_0 = arith.constant 0 : i32
    %c0_i32_1 = arith.constant 0 : i32
    return %c0_i32, %c0_i32_0 : i32, i32
  }
  func.func @transform_6(%arg0: i32) -> (i32, i32) {
    %c0_i32 = arith.constant 0 : i32
    %c0_i32_0 = arith.constant 0 : i32
    %c0_i32_1 = arith.constant 0 : i32
    return %c0_i32, %c0_i32_0 : i32, i32
  }
  func.func @transform_7(%arg0: i32) -> (i32, i32) {
    %c0_i32 = arith.constant 0 : i32
    %c0_i32_0 = arith.constant 0 : i32
    return %arg0, %c0_i32 : i32, i32
  }
}

</mosaic_0001>

<bundles_post_ra>
// kernel: classifier_forward.1
= control target key start
LH: loop header
LB: loop body
LE: loop exit
PB: predicated region body
PF: predicated region fallthrough
CT: control target
= control target key end

     0   :  { %12 = vsyncpa [#allocation3], 0  ;;  %s712_s0 = inlined_call_operand.vmem [shape: f32[8,32], index: 0, kind: input, shape index: {}]   ;;  %s713_s1 = inlined_call_operand.hbm [shape: bf16[32,128], index: 1, kind: input, shape index: {}]   ;;  %s714_s2 = inlined_call_operand.vmem [shape: f32[1,128], index: 2, kind: input, shape index: {}]   ;;  %s715_s3 = inlined_call_operand.hbm [shape: bf16[128,128], index: 3, kind: input, shape index: {}]   ;;  %s716_s4 = inlined_call_operand.vmem [shape: f32[1,128], index: 4, kind: input, shape index: {}]   ;;  %s717_s5 = inlined_call_operand.hbm [shape: bf16[128,128], index: 5, kind: input, shape index: {}]   ;;  %s718_s6 = inlined_call_operand.vmem [shape: f32[1,128], index: 6, kind: input, shape index: {}]   ;;  %s719_s7 = inlined_call_operand.vmem [shape: bf16[8,128], index: 7, kind: output, shape index: {}]  }
   0x1   :  { %13 = vsyncpa [#allocation5], 0  ;;  %s574_s24 = smov [#allocation4]   ;;  %s575_s26 = smov [#allocation2]  }
   0x2   :  { %s35_s25 = sshll.u32 %s574_s24, 4  ;;  %s21_s27 = sshll.u32 %s575_s26, 4  ;;  %s36_s25 = int_to_ptr.vmem [resolvable:$true] %s35_s25  ;;  %s621_s27 = int_to_ptr.vmem [resolvable:$true] %s21_s27 }
   0x3   :  { %s504_s30 = scalar_lea.hbm %s715_s3, 1024 }
   0x4   :  { %p505_p0 = scmp.ne.s32.totalorder %s715_s3, %s504_s30  ;;  %p508_p1 = scmp.lt.u32.totalorder %s504_s30, %s715_s3 }
   0x6   :  { %p510_p2 = pnand %p508_p1, %p505_p0 }
   0x8   :  { %513 = shalt.err (!%p510_p2)
}
   0x9   :  { %s514_s12 = scalar_lea.vmem %s36_s25, 1024  ;;  %p519_p4 = scmp.lt.s32.totalorder %s36_s25, %s36_s25 }
   0xa   :  { %p515_p3 = scmp.ne.s32.totalorder %s36_s25, %s514_s12  ;;  %p520_p5 = scmp.lt.s32.totalorder %s514_s12, %s514_s12 }
   0xc   :  { %p521_p6 = por %p520_p5, %p519_p4 }
   0xe   :  { %p522_p7 = pnand %p521_p6, %p515_p3 }
  0x10   :  { %525 = shalt.err (!%p522_p7)
}
  0x11   :  { %s576_s13 = smov 64   ;;  %s577_s14 = smov 4  }
  0x12   :  { %41 = dma.hbm_to_vmem [thread:$0]  %s715_s3, 1024, %s36_s25, [#allocation5], %s576_s13, %s576_s13, %s577_s14  }
  0x13   :  { %s526_s19 = scalar_lea.hbm %s713_s1, 256 }
  0x14   :  { %p527_p8 = scmp.ne.s32.totalorder %s713_s1, %s526_s19  ;;  %p530_p9 = scmp.lt.u32.totalorder %s526_s19, %s713_s1 }
  0x16   :  { %p532_p10 = pnand %p530_p9, %p527_p8 }
  0x18   :  { %535 = shalt.err (!%p532_p10)
}
  0x19   :  { %s536_s24 = scalar_lea.vmem %s621_s27, 256  ;;  %p541_p12 = scmp.lt.s32.totalorder %s621_s27, %s621_s27 }
  0x1a   :  { %p537_p11 = scmp.ne.s32.totalorder %s621_s27, %s536_s24  ;;  %p542_p13 = scmp.lt.s32.totalorder %s536_s24, %s536_s24 }
  0x1c   :  { %p543_p0 = por %p542_p13, %p541_p12 }
  0x1e   :  { %p544_p1 = pnand %p543_p0, %p537_p11 }
  0x20   :  { %547 = shalt.err (!%p544_p1)
}
  0x21   :  { %27 = dma.hbm_to_vmem [thread:$0]  %s713_s1, 256, %s621_s27, [#allocation3], %s576_s13, %s576_s13, %s577_s14  }
  0x22   :  { %s578_s26 = smov [#allocation6]   ;;  %s548_s8 = scalar_lea.hbm %s717_s5, 1024 }
  0x23   :  { %s49_s28 = sshll.u32 %s578_s26, 4  ;;  %p549_p2 = scmp.ne.s32.totalorder %s717_s5, %s548_s8  ;;  %s50_s28 = int_to_ptr.vmem [resolvable:$true] %s49_s28 }
  0x24   :  { %p552_p3 = scmp.lt.u32.totalorder %s548_s8, %s717_s5 }
  0x26   :  { %p554_p4 = pnand %p552_p3, %p549_p2 }
  0x28   :  { %557 = shalt.err (!%p554_p4)
}
  0x29   :  { %s558_s15 = scalar_lea.vmem %s50_s28, 1024  ;;  %p563_p6 = scmp.lt.s32.totalorder %s50_s28, %s50_s28 }
  0x2a   :  { %p559_p5 = scmp.ne.s32.totalorder %s50_s28, %s558_s15  ;;  %p564_p7 = scmp.lt.s32.totalorder %s558_s15, %s558_s15 }
  0x2c   :  { %p565_p8 = por %p564_p7, %p563_p6 }
  0x2e   :  { %p566_p9 = pnand %p565_p8, %p559_p5 }
  0x30   :  { %569 = shalt.err (!%p566_p9)
}
  0x31   :  { %55 = dma.hbm_to_vmem [thread:$0]  %s717_s5, 1024, %s50_s28, [#allocation5], %s576_s13, %s576_s13, %s577_s14  }
  0x32   :  { %570 = dma.done.wait [#allocation3], 256  }
  0x33   :  { %571 = vsyncadd [#allocation3], 4294967040 }
  0x34   :  { %572 = dma.done.wait [#allocation5], 2048  }
  0x35   :  { %573 = vsyncadd [#allocation5], 4294965248  ;;  %v579_v0 = vmov 0.0   ;;  %vm580_vm0 = vmmov 0   ;;  %v482_v1 = vld [vmem:[#allocation2] sm:$0xff]   ;;  %v483_v2 = vld [vmem:[#allocation2 + $0x8] sm:$0xff]  }
  0x36   :  { %427 = vmatprep.subr.bf16.mxu0 %v579_v0  ;;  %431 = vmatprep.mubr.msk.bf16.mxu0 %vm580_vm0, %v579_v0  ;;  %v68_v3 = vld [vmem:[%s712_s0] sm:$0xff]  ;;  %v484_v4 = vld [vmem:[#allocation4] sm:$0xff]   ;;  %v485_v6 = vld [vmem:[#allocation4 + $0x8] sm:$0xff]   ;;  %vm93_vm1 = vcmask 261120  }
  0x37   :  { %435 = vmatprep.subr.bf16.mxu1 %v579_v0  ;;  %451 = vmatprep.mubr.msk.bf16.mxu1 %vm580_vm0, %v579_v0  ;;  %v74_v5 = vpack.c.bf16 %v68_v3, %v68_v3  ;;  %v486_v7 = vld [vmem:[#allocation4 + $0x10] sm:$0xff]   ;;  %v487_v8 = vld [vmem:[#allocation4 + $0x18] sm:$0xff]   ;;  %v488_v9 = vld [vmem:[#allocation4 + $0x20] sm:$0xff]  }
  0x38   :  { %428 = vmatpush3.bf16.msra.mxu0 %v482_v1  ;;  %436 = vmatpush3.bf16.msra.mxu1 %v484_v4  ;;  %v489_v10 = vld [vmem:[#allocation4 + $0x28] sm:$0xff]   ;;  %v490_v11 = vld [vmem:[#allocation4 + $0x30] sm:$0xff]   ;;  %v491_v12 = vld [vmem:[#allocation4 + $0x38] sm:$0xff]  }
  0x39   :  { %429 = vmatprep.subr.bf16.mxu0 %v579_v0  ;;  %437 = vmatprep.subr.bf16.mxu1 %v579_v0  ;;  %v492_v13 = vld [vmem:[#allocation6] sm:$0xff]   ;;  %v493_v14 = vld [vmem:[#allocation6 + $0x8] sm:$0xff]   ;;  %v494_v15 = vld [vmem:[#allocation6 + $0x10] sm:$0xff]  }
  0x3a   :  { %v495_v16 = vld [vmem:[#allocation6 + $0x18] sm:$0xff]   ;;  %v496_v17 = vld [vmem:[#allocation6 + $0x20] sm:$0xff]   ;;  %v497_v18 = vld [vmem:[#allocation6 + $0x28] sm:$0xff]  }
  0x3b   :  { %v384_v19 = vld [vmem:[%s714_s2] ss:$0 sm:$0xff]  ;;  %v499_v28 = vld [vmem:[#allocation6 + $0x38] sm:$0xff]  }
  0x3c   :  { %430 = vmatpush3.bf16.msra.mxu0 %v483_v2  ;;  %438 = vmatpush3.bf16.msra.mxu1 %v485_v6  ;;  %v498_v27 = vld [vmem:[#allocation6 + $0x30] sm:$0xff]  }
  0x3d   :  { %455 = vmatprep.subr.bf16.mxu0 %v579_v0  ;;  %439 = vmatprep.subr.bf16.mxu1 %v579_v0  ;;  %v388_v29 = vld [vmem:[%s716_s4] ss:$0 sm:$0xff] }
  0x3e   :  { %v397_v37 = vld [vmem:[%s718_s6] ss:$0 sm:$0xff] }
  0x3f   :  { %432 = vmatmul.mubr.msk.bf16.vlgmr.msra.gmra.mrb[0].mxu0 %vm93_vm1, %v74_v5 }
  0x40   :  { %471 = vmatprep.mubr.msk.bf16.mxu0 %vm580_vm0, %v579_v0  ;;  %440 = vmatpush3.bf16.msra.mxu1 %v486_v7 }
  0x41   :  { %441 = vmatprep.subr.bf16.mxu1 %v579_v0  ;;  %456 = vmatpush3.bf16.msra.mxu0 %v492_v13 }
  0x42   :  { %457 = vmatprep.subr.bf16.mxu0 %v579_v0 }
  0x44   :  { %442 = vmatpush3.bf16.msra.mxu1 %v487_v8 }
  0x45   :  { %443 = vmatprep.subr.bf16.mxu1 %v579_v0  ;;  %458 = vmatpush3.bf16.msra.mxu0 %v493_v14 }
  0x46   :  { %459 = vmatprep.subr.bf16.mxu0 %v579_v0 }
  0x48   :  { %444 = vmatpush3.bf16.msra.mxu1 %v488_v9 }
  0x49   :  { %445 = vmatprep.subr.bf16.mxu1 %v579_v0  ;;  %460 = vmatpush3.bf16.msra.mxu0 %v494_v15 }
  0x4a   :  { %461 = vmatprep.subr.bf16.mxu0 %v579_v0 }
  0x4c   :  { %446 = vmatpush3.bf16.msra.mxu1 %v489_v10 }
  0x4d   :  { %447 = vmatprep.subr.bf16.mxu1 %v579_v0  ;;  %462 = vmatpush3.bf16.msra.mxu0 %v495_v16 }
  0x4e   :  { %463 = vmatprep.subr.bf16.mxu0 %v579_v0 }
  0x50   :  { %448 = vmatpush3.bf16.msra.mxu1 %v490_v11 }
  0x51   :  { %449 = vmatprep.subr.bf16.mxu1 %v579_v0  ;;  %464 = vmatpush3.bf16.msra.mxu0 %v496_v17 }
  0x52   :  { %465 = vmatprep.subr.bf16.mxu0 %v579_v0 }
  0x54   :  { %450 = vmatpush3.bf16.msra.mxu1 %v491_v12 }
  0x55   :  { %466 = vmatpush3.bf16.msra.mxu0 %v497_v18 }
  0x56   :  { %467 = vmatprep.subr.bf16.mxu0 %v579_v0 }
  0x59   :  { %468 = vmatpush3.bf16.msra.mxu0 %v498_v27 }
  0x5a   :  { %469 = vmatprep.subr.bf16.mxu0 %v579_v0 }
  0x5d   :  { %470 = vmatpush3.bf16.msra.mxu0 %v499_v28 }
 0x112   :  { %v131_v20 = vpop.f32.mrb[0].mxu0 }
 0x113   :  { %v132_v21 = vadd.f32 %v384_v19, %v131_v20  ;;  %v433_v22 = vpop.f32.mrb[1].mxu0 }
 0x114   :  { %v134_v23 = vpop.f32.mrb[2].mxu0 }
 0x115   :  { %v137_v24 = vmax.f32 %v132_v21, 0.0  ;;  %v434_v25 = vpop.f32.mrb[3].mxu0 }
 0x117   :  { %v155_v26 = vpack.c.bf16 %v137_v24, %v137_v24 }
 0x119   :  { %452 = vmatmul.mubr.bf16.vlgmr.msra.gmra.mrb[0].mxu1 %v155_v26 }
 0x1ec   :  { %v244_v30 = vpop.f32.mrb[0].mxu1 }
 0x1ed   :  { %v245_v31 = vadd.f32 %v388_v29, %v244_v30  ;;  %v453_v32 = vpop.f32.mrb[1].mxu1 }
 0x1ee   :  { %v247_v33 = vpop.f32.mrb[2].mxu1 }
 0x1ef   :  { %v250_v34 = vmax.f32 %v245_v31, 0.0  ;;  %v454_v35 = vpop.f32.mrb[3].mxu1 }
 0x1f1   :  { %v268_v36 = vpack.c.bf16 %v250_v34, %v250_v34 }
 0x1f3   :  { %472 = vmatmul.mubr.bf16.vlgmr.msra.gmra.mrb[4].mxu0 %v268_v36 }
 0x2c6   :  { %v357_v38 = vpop.f32.mrb[4].mxu0 }
 0x2c7   :  { %v358_v39 = vadd.f32 %v397_v37, %v357_v38  ;;  %v473_v40 = vpop.f32.mrb[5].mxu0 }
 0x2c8   :  { %v360_v41 = vpop.f32.mrb[6].mxu0 }
 0x2c9   :  { %363 = vmax.xlane.f32.xlu0 %v358_v39  ;;  %v474_v42 = vpop.f32.mrb[7].mxu0 }
 0x356   :  { %v364_v43 = vpop.xlane.xlu0 %363 }
 0x357   :  { %v365_v44 = vsub.f32 %v358_v39, %v364_v43 }
 0x359   :  { %v366_v45 = vpack.c.bf16 %v365_v44, %v365_v44 }
 0x35b   :  { %v368_v46 = vmul.bf16 1069105081, %v366_v45 }
 0x35d   :  { %500 = vpow.bf16 %v368_v46 }
 0x368   :  { %v501_v47 = vpop.eup %500 }
 0x369   :  { %v370_v48 = vunpack.c.l.bf16 %v501_v47 }
 0x36b   :  { %371 = vadd.xlane.f32.xlu0 %v370_v48 }
 0x3f8   :  { %v372_v49 = vpop.xlane.xlu0 %371 }
 0x3f9   :  { %502 = vlog2.f32 %v372_v49 }
 0x403   :  { %v503_v50 = vpop.eup %502 }
 0x404   :  { %v374_v51 = vmul.f32 0.6931472, %v503_v50 }
 0x406   :  { %v375_v52 = vsub.f32 %v365_v44, %v374_v51 }
 0x408   :  { %v376_v53 = vpack.c.bf16 %v375_v52, %v375_v52 }
 0x40a   :  { %377 = vst [vmem:[%s719_s7] sm:$0xf] %v376_v53 }
 0x40b   :  { %382 = vsyncpa [#allocation3], 1 }
 0x40c   :  { %383 = vsyncpa [#allocation5], 1 }

</bundles_post_ra>
